<compile_context>
chip_gen: v6e
topology: v6e:2x2x1
jax: 0.10.0
libtpu: 0.0.40
codegen_flags: <defaults>
</compile_context>

<pallas_src>
import numpy as np
import jax
import jax.numpy as jnp
from jax.experimental import pallas as pl
from jax.experimental.pallas import tpu as pltpu

# ---- module configuration: ConvBlockIso(input=4, output=8, kernel_size=3, padding='same')
B, C_IN, H, W = 2, 4, 16, 16
C_OUT = 8
KSIZE = 3
PAD = 1                               # 'same' padding, stride=1, k=3  ->  pad 1

# ---- derived layout constants (all lane offsets 128-aligned by construction)
OH, OW = H, W                         # 'same' conv, stride 1
C_PAD = 8                             # channels zero-padded 4 -> 8 (aligned 8-row tap slots)
WROW = 24                             # padded flat row stride  (1 left + 16 + 7 right)
HROWS = H + 2 * PAD                   # 18 padded rows
S_BATCH = 512                         # per-batch flat stride (input AND output), 4x128
N_LANES = B * S_BATCH                 # 1024 = combined lane width of patches / output
FLAT_IN = N_LANES + 128               # 1152 >= max tap offset (50) + N_LANES
KKC = KSIZE * KSIZE * C_PAD           # 72 = contraction size (tap-major, channel-minor)

assert HROWS * WROW <= S_BATCH
assert (KSIZE - 1) * WROW + (KSIZE - 1) + N_LANES <= FLAT_IN
assert OH * WROW <= S_BATCH


# ----------------------------------- Pallas kernel --------------------------------------------
def conv_relu_kernel(x_ref, w_ref, b_ref, o_ref, p_ref):
    # x_ref: (C_PAD, FLAT_IN)   bf16  zero-padded, row-flattened input; batch b's image at
    #                                 lane offset b*S_BATCH, row stride WROW; rows 4..7 zero.
    # w_ref: (C_OUT, KKC)       bf16  tap-major / channel-minor weights (pad channels zero).
    # b_ref: (C_OUT, 1)         f32   bias column.
    # o_ref: (C_OUT, N_LANES)   f32   one lane-dense output slab: column b*S_BATCH + oh*WROW + ow.
    # p_ref: (KKC, N_LANES)     bf16  implicit-im2col scratch; tap t in aligned rows [8t, 8t+8).
    x = x_ref[...]                                     # single VMEM load (item 4)
    for di in range(KSIZE):
        for dj in range(KSIZE):
            t = di * KSIZE + dj
            s = di * WROW + dj
            # aligned 8-row, full-1024-lane store; per-batch stride matches the output's,
            # so one slice covers both batches (cross-batch bleed lands only in junk cols).
            p_ref[t * C_PAD:(t + 1) * C_PAD, :] = x[:, s:s + N_LANES]

    # Single fat MXU matmul: (8, 72) @ (72, 1024) -> (8, 1024), f32 accumulate.
    acc = jnp.dot(w_ref[...], p_ref[...], preferred_element_type=jnp.float32)
    acc = jnp.maximum(acc + b_ref[...], 0.0)           # fused bias + ReLU on the f32 acc
    o_ref[...] = acc.astype(o_ref.dtype)               # one unmasked lane-dense store (item 1)


# ----------------------------------- wrapper ---------------------------------------------------
def prepare_params(w, bias):
    """Parameter prep -- run once at init, not per forward call (review item 7)."""
    # w_flat[o, (di*K + dj)*C_PAD + c] = w[o, c, di, dj] for c < C_IN, else 0.
    wt = jnp.transpose(w, (0, 2, 3, 1))                                   # (C_OUT, K, K, C_IN)
    wt = jnp.pad(wt, ((0, 0), (0, 0), (0, 0), (0, C_PAD - C_IN)))         # pad channel slots
    w_flat = wt.reshape(C_OUT, KKC).astype(jnp.bfloat16)
    b_col = bias.reshape(C_OUT, 1).astype(jnp.float32)
    return w_flat, b_col


@jax.jit
def conv_block_iso(x, w_flat, b_col):
    # ---- input layout plumbing (pad / reshape / transpose only; fused by XLA) ----
    xp = jnp.pad(x, ((0, 0), (0, C_PAD - C_IN), (PAD, PAD), (PAD, WROW - W - PAD)))
    xf = xp.reshape(B, C_PAD, HROWS * WROW)                               # (B, 8, 432)
    xf = jnp.pad(xf, ((0, 0), (0, 0), (0, S_BATCH - HROWS * WROW)))       # (B, 8, 512)
    x_comb = jnp.transpose(xf, (1, 0, 2)).reshape(C_PAD, N_LANES)         # (8, 1024)
    x_comb = jnp.pad(x_comb, ((0, 0), (0, FLAT_IN - N_LANES))).astype(jnp.bfloat16)

    out_slab = pl.pallas_call(
        conv_relu_kernel,
        out_shape=jax.ShapeDtypeStruct((C_OUT, N_LANES), x.dtype),
        in_specs=[
            pl.BlockSpec(memory_space=pltpu.MemorySpace.VMEM),
            pl.BlockSpec(memory_space=pltpu.MemorySpace.VMEM),
            pl.BlockSpec(memory_space=pltpu.MemorySpace.VMEM),
        ],
        out_specs=pl.BlockSpec(memory_space=pltpu.MemorySpace.VMEM),
        scratch_shapes=[pltpu.VMEM((KKC, N_LANES), jnp.bfloat16)],
    )(x_comb, w_flat, b_col)

    # ---- restore NCHW, drop junk columns (pure layout) ----
    out = out_slab.reshape(C_OUT, B, S_BATCH)[:, :, :OH * WROW]
    out = jnp.transpose(out, (1, 0, 2)).reshape(B, C_OUT, OH, WROW)[:, :, :, :OW]
    return out


# ----------------------------------- numpy reference ------------------------------------------
def reference(x, w, bias):
    xp = np.pad(x.astype(np.float64), ((0, 0), (0, 0), (PAD, PAD), (PAD, PAD)))
    out = np.zeros((B, C_OUT, OH, OW), np.float64)
    for di in range(KSIZE):
        for dj in range(KSIZE):
            patch = xp[:, :, di:di + OH, dj:dj + OW]
            out += np.einsum('oc,bchw->bohw', w[:, :, di, dj].astype(np.float64), patch)
    out += bias.astype(np.float64)[None, :, None, None]
    return np.maximum(out, 0.0)


# ----------------------------------------- main ------------------------------------------------
if __name__ == "__main__":
    key = jax.random.PRNGKey(0)
    kx, kw, kb = jax.random.split(key, 3)

    x = jax.random.normal(kx, (B, C_IN, H, W), jnp.float32)
    w = jax.random.normal(kw, (C_OUT, C_IN, KSIZE, KSIZE), jnp.float32) * 0.1
    bias = jax.random.normal(kb, (C_OUT,), jnp.float32) * 0.1

    w_flat, b_col = prepare_params(w, bias)            # once, outside the per-call path
    out = jax.block_until_ready(conv_block_iso(x, w_flat, b_col))

    ref = reference(np.asarray(x), np.asarray(w), np.asarray(bias))
    assert out.shape == (B, C_OUT, OH, OW)
    if not np.allclose(np.asarray(out), ref, rtol=2e-2, atol=5e-2):
        raise AssertionError("Pallas kernel output does not match reference")
    print("KERNEL_OK")
</pallas_src>

<mosaic_0001>
module attributes {stable_mosaic.version = 11 : i64} {
  func.func @conv_relu_kernel(%arg0: memref<8x1152xbf16, #tpu.memory_space<vmem>>, %arg1: memref<8x72xbf16, #tpu.memory_space<vmem>>, %arg2: memref<8x1xf32, #tpu.memory_space<vmem>>, %arg3: memref<8x1024xf32, #tpu.memory_space<vmem>>, %arg4: memref<72x1024xbf16, #tpu.memory_space<vmem>>) attributes {dimension_semantics = [], scalar_prefetch = 0 : i64, scratch_operands = 1 : i64, tpu.core_type = #tpu.core_type<tc>} {
    %c0 = arith.constant 0 : index
    %c0_0 = arith.constant 0 : index
    %0 = vector.load %arg0[%c0, %c0_0] : memref<8x1152xbf16, #tpu.memory_space<vmem>>, vector<8x1152xbf16>
    %1 = vector.extract_strided_slice %0 {offsets = [0, 0], sizes = [8, 1024], strides = [1, 1]} : vector<8x1152xbf16> to vector<8x1024xbf16>
    %c0_1 = arith.constant 0 : index
    %c0_2 = arith.constant 0 : index
    %2 = vector.load %arg4[%c0_1, %c0_2] : memref<72x1024xbf16, #tpu.memory_space<vmem>>, vector<8x1024xbf16>
    tpu.vector_store %arg4[%c0_1, %c0_2], %1 {strides = array<i32>} : memref<72x1024xbf16, #tpu.memory_space<vmem>>, vector<8x1024xbf16>,
    %3 = vector.extract_strided_slice %0 {offsets = [0, 1], sizes = [8, 1024], strides = [1, 1]} : vector<8x1152xbf16> to vector<8x1024xbf16>
    %c8 = arith.constant 8 : index
    %c0_3 = arith.constant 0 : index
    %4 = vector.load %arg4[%c8, %c0_3] : memref<72x1024xbf16, #tpu.memory_space<vmem>>, vector<8x1024xbf16>
    tpu.vector_store %arg4[%c8, %c0_3], %3 {strides = array<i32>} : memref<72x1024xbf16, #tpu.memory_space<vmem>>, vector<8x1024xbf16>,
    %5 = vector.extract_strided_slice %0 {offsets = [0, 2], sizes = [8, 1024], strides = [1, 1]} : vector<8x1152xbf16> to vector<8x1024xbf16>
    %c16 = arith.constant 16 : index
    %c0_4 = arith.constant 0 : index
    %6 = vector.load %arg4[%c16, %c0_4] : memref<72x1024xbf16, #tpu.memory_space<vmem>>, vector<8x1024xbf16>
    tpu.vector_store %arg4[%c16, %c0_4], %5 {strides = array<i32>} : memref<72x1024xbf16, #tpu.memory_space<vmem>>, vector<8x1024xbf16>,
    %7 = vector.extract_strided_slice %0 {offsets = [0, 24], sizes = [8, 1024], strides = [1, 1]} : vector<8x1152xbf16> to vector<8x1024xbf16>
    %c24 = arith.constant 24 : index
    %c0_5 = arith.constant 0 : index
    %8 = vector.load %arg4[%c24, %c0_5] : memref<72x1024xbf16, #tpu.memory_space<vmem>>, vector<8x1024xbf16>
    tpu.vector_store %arg4[%c24, %c0_5], %7 {strides = array<i32>} : memref<72x1024xbf16, #tpu.memory_space<vmem>>, vector<8x1024xbf16>,
    %9 = vector.extract_strided_slice %0 {offsets = [0, 25], sizes = [8, 1024], strides = [1, 1]} : vector<8x1152xbf16> to vector<8x1024xbf16>
    %c32 = arith.constant 32 : index
    %c0_6 = arith.constant 0 : index
    %10 = vector.load %arg4[%c32, %c0_6] : memref<72x1024xbf16, #tpu.memory_space<vmem>>, vector<8x1024xbf16>
    tpu.vector_store %arg4[%c32, %c0_6], %9 {strides = array<i32>} : memref<72x1024xbf16, #tpu.memory_space<vmem>>, vector<8x1024xbf16>,
    %11 = vector.extract_strided_slice %0 {offsets = [0, 26], sizes = [8, 1024], strides = [1, 1]} : vector<8x1152xbf16> to vector<8x1024xbf16>
    %c40 = arith.constant 40 : index
    %c0_7 = arith.constant 0 : index
    %12 = vector.load %arg4[%c40, %c0_7] : memref<72x1024xbf16, #tpu.memory_space<vmem>>, vector<8x1024xbf16>
    tpu.vector_store %arg4[%c40, %c0_7], %11 {strides = array<i32>} : memref<72x1024xbf16, #tpu.memory_space<vmem>>, vector<8x1024xbf16>,
    %13 = vector.extract_strided_slice %0 {offsets = [0, 48], sizes = [8, 1024], strides = [1, 1]} : vector<8x1152xbf16> to vector<8x1024xbf16>
    %c48 = arith.constant 48 : index
    %c0_8 = arith.constant 0 : index
    %14 = vector.load %arg4[%c48, %c0_8] : memref<72x1024xbf16, #tpu.memory_space<vmem>>, vector<8x1024xbf16>
    tpu.vector_store %arg4[%c48, %c0_8], %13 {strides = array<i32>} : memref<72x1024xbf16, #tpu.memory_space<vmem>>, vector<8x1024xbf16>,
    %15 = vector.extract_strided_slice %0 {offsets = [0, 49], sizes = [8, 1024], strides = [1, 1]} : vector<8x1152xbf16> to vector<8x1024xbf16>
    %c56 = arith.constant 56 : index
    %c0_9 = arith.constant 0 : index
    %16 = vector.load %arg4[%c56, %c0_9] : memref<72x1024xbf16, #tpu.memory_space<vmem>>, vector<8x1024xbf16>
    tpu.vector_store %arg4[%c56, %c0_9], %15 {strides = array<i32>} : memref<72x1024xbf16, #tpu.memory_space<vmem>>, vector<8x1024xbf16>,
    %17 = vector.extract_strided_slice %0 {offsets = [0, 50], sizes = [8, 1024], strides = [1, 1]} : vector<8x1152xbf16> to vector<8x1024xbf16>
    %c64 = arith.constant 64 : index
    %c0_10 = arith.constant 0 : index
    %18 = vector.load %arg4[%c64, %c0_10] : memref<72x1024xbf16, #tpu.memory_space<vmem>>, vector<8x1024xbf16>
    tpu.vector_store %arg4[%c64, %c0_10], %17 {strides = array<i32>} : memref<72x1024xbf16, #tpu.memory_space<vmem>>, vector<8x1024xbf16>,
    %c0_11 = arith.constant 0 : index
    %c0_12 = arith.constant 0 : index
    %19 = vector.load %arg1[%c0_11, %c0_12] : memref<8x72xbf16, #tpu.memory_space<vmem>>, vector<8x72xbf16>
    %c0_13 = arith.constant 0 : index
    %c0_14 = arith.constant 0 : index
    %20 = vector.load %arg4[%c0_13, %c0_14] : memref<72x1024xbf16, #tpu.memory_space<vmem>>, vector<72x1024xbf16>
    %cst = arith.constant dense<0.000000e+00> : vector<8x1024xf32>
    %21 = tpu.matmul %19, %20, %cst {dimension_numbers = #tpu.dot_dimension_numbers<[1], [0], [0], [1], [0, 0, 1, 1], [], []>} : vector<8x72xbf16>, vector<72x1024xbf16>, vector<8x1024xf32> -> vector<8x1024xf32>
    %c0_15 = arith.constant 0 : index
    %c0_16 = arith.constant 0 : index
    %22 = vector.load %arg2[%c0_15, %c0_16] : memref<8x1xf32, #tpu.memory_space<vmem>>, vector<8x1xf32>
    %23 = vector.broadcast %22 : vector<8x1xf32> to vector<8x1024xf32>
    %24 = arith.addf %21, %23 : vector<8x1024xf32>
    %cst_17 = arith.constant 0.000000e+00 : f32
    %25 = vector.broadcast %cst_17 : f32 to vector<8x1024xf32>
    %26 = arith.maximumf %24, %25 : vector<8x1024xf32>
    %c0_18 = arith.constant 0 : index
    %c0_19 = arith.constant 0 : index
    %27 = vector.load %arg3[%c0_18, %c0_19] : memref<8x1024xf32, #tpu.memory_space<vmem>>, vector<8x1024xf32>
    tpu.vector_store %arg3[%c0_18, %c0_19], %26 {strides = array<i32>} : memref<8x1024xf32, #tpu.memory_space<vmem>>, vector<8x1024xf32>,
    return
  }
}

</mosaic_0001>

<bundles_post_ra>
// kernel: conv_block_iso.1
= control target key start
LH: loop header
LB: loop body
LE: loop exit
PB: predicated region body
PF: predicated region fallthrough
CT: control target
= control target key end

     0   :  { %s780_s16 = smov 78   ;;  %s781_s19 = smov 80   ;;  %v788_v3 = vmov 0   ;;  %vm44_vm0 = vcmask 1043456   ;;  %vm270_vm1 = vcmask 637952   ;;  %vm206_vm2 = vcmask 654336   ;;  %s1078_s0 = inlined_call_operand.vmem [shape: bf16[8,1152], index: 0, kind: input, shape index: {}]   ;;  %s1079_s2 = inlined_call_operand.vmem [shape: f32[8,1], index: 2, kind: input, shape index: {}]   ;;  %s1080_s1 = inlined_call_operand.vmem [shape: bf16[8,72], index: 1, kind: input, shape index: {}]   ;;  %s1081_s3 = inlined_call_operand.vmem [shape: f32[8,1024], index: 3, kind: output, shape index: {}]  }
   0x1   :  { %v812_v0 = vld [vmem:[%s1078_s0 + $0x10] sm:$0xff]  ;;  %v817_v1 = vld [vmem:[%s1078_s0] sm:$0xff]  ;;  %v826_v2 = vld [vmem:[%s1078_s0 + $0x8] sm:$0xff]  ;;  %s782_s20 = smov 79   ;;  %s783_s21 = smov 103   ;;  %570 = vmatprep.mubr.bf16.mxu0 %v788_v3  ;;  %611 = vmatprep.mubr.bf16.mxu1 %v788_v3  ;;  %vm238_vm3 = vcmask 646144  }
   0x2   :  { %258 = vrot.lane.b32.xlu1 %v812_v0, %s780_s16  ;;  %254 = vrot.lane.b32.xlu0 %v817_v1, %s780_s16  ;;  %s784_s22 = smov 102   ;;  %s785_s23 = smov 126   ;;  %v19_v4 = vld [vmem:[%s1078_s0 + $0x20] sm:$0xf]  ;;  %v872_v5 = vld [vmem:[%s1078_s0 + $0x18] sm:$0xff]  ;;  %vm142_vm4 = vcmask 842752  }
   0x3   :  { %s786_s24 = smov 104   ;;  %s787_s25 = smov 127   ;;  %779 = vset.pattern.permute.xlu0 %v788_v3  ;;  %v323_v6 = vld [vmem:[%s1079_s2] sm:$0xff]  ;;  %vm174_vm5 = vcmask 834560   ;;  %vm78_vm6 = vcmask 1031168   ;;  %vm110_vm7 = vcmask 850944  }
   0x4   :  { %vm46_vm8 = vcmask 1039360   ;;  %vm509_vm9 = vcmask 588800  }
   0x6   :  { %190 = vrot.lane.b32.xlu1 %v817_v1, %s781_s19  ;;  %256 = vrot.lane.b32.xlu0 %v826_v2, %s780_s16 }
   0xa   :  { %194 = vrot.lane.b32.xlu1 %v812_v0, %s781_s19  ;;  %192 = vrot.lane.b32.xlu0 %v826_v2, %s781_s19 }
   0xe   :  { %224 = vrot.lane.b32.xlu1 %v826_v2, %s782_s20  ;;  %222 = vrot.lane.b32.xlu0 %v817_v1, %s782_s20 }
  0x12   :  { %126 = vrot.lane.b32.xlu1 %v817_v1, %s783_s21  ;;  %226 = vrot.lane.b32.xlu0 %v812_v0, %s782_s20 }
  0x16   :  { %130 = vrot.lane.b32.xlu1 %v812_v0, %s783_s21  ;;  %128 = vrot.lane.b32.xlu0 %v826_v2, %s783_s21 }
  0x1a   :  { %160 = vrot.lane.b32.xlu1 %v826_v2, %s784_s22  ;;  %158 = vrot.lane.b32.xlu0 %v817_v1, %s784_s22 }
  0x1e   :  { %62 = vrot.lane.b32.xlu1 %v817_v1, %s785_s23  ;;  %162 = vrot.lane.b32.xlu0 %v812_v0, %s784_s22 }
  0x22   :  { %66 = vrot.lane.b32.xlu1 %v812_v0, %s785_s23  ;;  %64 = vrot.lane.b32.xlu0 %v826_v2, %s785_s23 }
  0x26   :  { %96 = vrot.lane.b32.xlu1 %v826_v2, %s786_s24  ;;  %94 = vrot.lane.b32.xlu0 %v817_v1, %s786_s24 }
  0x2a   :  { %29 = vrot.lane.b32.xlu1 %v817_v1, %s787_s25  ;;  %98 = vrot.lane.b32.xlu0 %v812_v0, %s786_s24 }
  0x2e   :  { %33 = vrot.lane.b32.xlu1 %v812_v0, %s787_s25  ;;  %31 = vrot.lane.b32.xlu0 %v826_v2, %s787_s25 }
  0x32   :  { %262 = vrot.lane.b32.xlu1 %v19_v4, %s780_s16  ;;  %260 = vrot.lane.b32.xlu0 %v872_v5, %s780_s16 }
  0x36   :  { %198 = vrot.lane.b32.xlu1 %v19_v4, %s781_s19  ;;  %196 = vrot.lane.b32.xlu0 %v872_v5, %s781_s19 }
  0x3a   :  { %230 = vrot.lane.b32.xlu1 %v19_v4, %s782_s20  ;;  %228 = vrot.lane.b32.xlu0 %v872_v5, %s782_s20 }
  0x3e   :  { %134 = vrot.lane.b32.xlu1 %v19_v4, %s783_s21  ;;  %132 = vrot.lane.b32.xlu0 %v872_v5, %s783_s21 }
  0x42   :  { %166 = vrot.lane.b32.xlu1 %v19_v4, %s784_s22  ;;  %164 = vrot.lane.b32.xlu0 %v872_v5, %s784_s22 }
  0x46   :  { %70 = vrot.lane.b32.xlu1 %v19_v4, %s785_s23  ;;  %68 = vrot.lane.b32.xlu0 %v872_v5, %s785_s23 }
  0x4a   :  { %102 = vrot.lane.b32.xlu1 %v19_v4, %s786_s24  ;;  %100 = vrot.lane.b32.xlu0 %v872_v5, %s786_s24 }
  0x4e   :  { %37 = vrot.lane.b32.xlu1 %v19_v4, %s787_s25  ;;  %35 = vrot.lane.b32.xlu0 %v872_v5, %s787_s25 }
  0x52   :  { %326 = vperm.xlu0 %779, %v323_v6  }
  0x74   :  { %v895_v7 = vpop.permute.xlu1 %258  ;;  %v255_v8 = vpop.permute.xlu0 %254 }
  0x75   :  { %v266_v11 = vrot.slane %v895_v7, 4  ;;  %v264_v12 = vrot.slane %v255_v8, 4 }
  0x78   :  { %v191_v9 = vpop.permute.xlu1 %190  ;;  %v257_v10 = vpop.permute.xlu0 %256 }
  0x79   :  { %v265_v13 = vrot.slane %v257_v10, 4  ;;  %v200_v25 = vrot.slane %v191_v9, 4 }
  0x7b   :  { %v272_v14 = vsel %vm44_vm0, %v265_v13, %v266_v11  ;;  %v269_v15 = vsel %vm44_vm0, %v264_v12, %v265_v13 }
  0x7c   :  { %v273_v16 = vsel %vm270_vm1, %v257_v10, %v272_v14  ;;  %v903_v17 = vpop.permute.xlu1 %194  ;;  %v193_v18 = vpop.permute.xlu0 %192  ;;  %v271_v19 = vsel %vm270_vm1, %v255_v8, %v269_v15 }
  0x7d   :  { %v201_v20 = vrot.slane %v193_v18, 4  ;;  %v755_v21 = vcombine.high %v271_v19, %v271_v19  ;;  %v757_v22 = vcombine.high %v273_v16, %v273_v16  ;;  %v754_v23 = vcombine.low %v271_v19, %v271_v19 }
  0x7e   :  { %v756_v24 = vcombine.low %v273_v16, %v273_v16  ;;  %v202_v30 = vrot.slane %v903_v17, 4 }
  0x7f   :  { %762 = vmatprep.subr.msk.bf16.mxu0 %vm44_vm0, %v755_v21  ;;  %764 = vmatprep.subr.msk.bf16.mxu1 %vm44_vm0, %v757_v22  ;;  %v515_v27 = vsel %vm44_vm0, %v754_v23, 0  ;;  %v205_v32 = vsel %vm44_vm0, %v200_v25, %v201_v20 }
  0x80   :  { %v225_v26 = vpop.permute.xlu1 %224  ;;  %v521_v28 = vsel %vm44_vm0, %v756_v24, 0  ;;  %v223_v29 = vpop.permute.xlu0 %222  ;;  %545 = vmatpush1.bf16.msra.mxu0 %v515_v27  ;;  %v207_v35 = vsel %vm206_vm2, %v191_v9, %v205_v32  ;;  %v208_v39 = vsel %vm44_vm0, %v201_v20, %v202_v30 }
  0x81   :  { %v233_v31 = vrot.slane %v225_v26, 4  ;;  %586 = vmatpush1.bf16.msra.mxu1 %v521_v28  ;;  %v232_v33 = vrot.slane %v223_v29, 4  ;;  %v209_v44 = vsel %vm206_vm2, %v193_v18, %v208_v39 }
  0x83   :  { %v237_v34 = vsel %vm44_vm0, %v232_v33, %v233_v31 }
  0x84   :  { %v239_v36 = vsel %vm238_vm3, %v223_v29, %v237_v34  ;;  %v127_v37 = vpop.permute.xlu1 %126  ;;  %v915_v38 = vpop.permute.xlu0 %226 }
  0x85   :  { %v746_v40 = vcombine.low %v207_v35, %v239_v36  ;;  %v747_v41 = vcombine.high %v207_v35, %v239_v36  ;;  %v234_v42 = vrot.slane %v915_v38, 4  ;;  %v136_v51 = vrot.slane %v127_v37, 4 }
  0x87   :  { %v240_v43 = vsel %vm44_vm0, %v233_v31, %v234_v42  ;;  %546 = vmatprep.subr.bf16.mxu0 %v747_v41 }
  0x88   :  { %v925_v45 = vpop.permute.xlu1 %130  ;;  %547 = vmatpush1.bf16.msra.mxu0 %v746_v40  ;;  %v129_v46 = vpop.permute.xlu0 %128  ;;  %v241_v47 = vsel %vm238_vm3, %v225_v26, %v240_v43 }
  0x89   :  { %v137_v48 = vrot.slane %v129_v46, 4  ;;  %v749_v49 = vcombine.high %v209_v44, %v241_v47  ;;  %v748_v50 = vcombine.low %v209_v44, %v241_v47  ;;  %v138_v54 = vrot.slane %v925_v45, 4 }
  0x8b   :  { %587 = vmatprep.subr.bf16.mxu1 %v749_v49  ;;  %v141_v56 = vsel %vm44_vm0, %v136_v51, %v137_v48  ;;  %v144_v63 = vsel %vm44_vm0, %v137_v48, %v138_v54 }
  0x8c   :  { %v161_v52 = vpop.permute.xlu1 %160  ;;  %588 = vmatpush1.bf16.msra.mxu1 %v748_v50  ;;  %v159_v53 = vpop.permute.xlu0 %158  ;;  %v143_v59 = vsel %vm142_vm4, %v127_v37, %v141_v56  ;;  %v145_v10 = vsel %vm142_vm4, %v129_v46, %v144_v63 }
  0x8d   :  { %v169_v55 = vrot.slane %v161_v52, 4  ;;  %v168_v57 = vrot.slane %v159_v53, 4 }
  0x8f   :  { %v173_v58 = vsel %vm44_vm0, %v168_v57, %v169_v55 }
  0x90   :  { %v175_v60 = vsel %vm174_vm5, %v159_v53, %v173_v58  ;;  %v63_v61 = vpop.permute.xlu1 %62  ;;  %v933_v62 = vpop.permute.xlu0 %162 }
  0x91   :  { %v738_v4 = vcombine.low %v143_v59, %v175_v60  ;;  %v739_v6 = vcombine.high %v143_v59, %v175_v60  ;;  %v170_v8 = vrot.slane %v933_v62, 4  ;;  %v72_v19 = vrot.slane %v63_v61, 4 }
  0x93   :  { %v176_v9 = vsel %vm44_vm0, %v169_v55, %v170_v8  ;;  %548 = vmatprep.subr.bf16.mxu0 %v739_v6 }
  0x94   :  { %v943_v12 = vpop.permute.xlu1 %66  ;;  %549 = vmatpush1.bf16.msra.mxu0 %v738_v4  ;;  %v65_v13 = vpop.permute.xlu0 %64  ;;  %v177_v14 = vsel %vm174_vm5, %v161_v52, %v176_v9 }
  0x95   :  { %v73_v15 = vrot.slane %v65_v13, 4  ;;  %v741_v16 = vcombine.high %v145_v10, %v177_v14  ;;  %v740_v18 = vcombine.low %v145_v10, %v177_v14  ;;  %v74_v22 = vrot.slane %v943_v12, 4 }
  0x97   :  { %589 = vmatprep.subr.bf16.mxu1 %v741_v16  ;;  %v77_v24 = vsel %vm44_vm0, %v72_v19, %v73_v15  ;;  %v80_v32 = vsel %vm44_vm0, %v73_v15, %v74_v22 }
  0x98   :  { %v97_v20 = vpop.permute.xlu1 %96  ;;  %590 = vmatpush1.bf16.msra.mxu1 %v740_v18  ;;  %v95_v21 = vpop.permute.xlu0 %94  ;;  %v79_v27 = vsel %vm78_vm6, %v63_v61, %v77_v24  ;;  %v81_v37 = vsel %vm78_vm6, %v65_v13, %v80_v32 }
  0x99   :  { %v105_v23 = vrot.slane %v97_v20, 4  ;;  %v104_v25 = vrot.slane %v95_v21, 4 }
  0x9b   :  { %v109_v26 = vsel %vm44_vm0, %v104_v25, %v105_v23 }
  0x9c   :  { %v111_v28 = vsel %vm110_vm7, %v95_v21, %v109_v26  ;;  %v30_v29 = vpop.permute.xlu1 %29  ;;  %v951_v31 = vpop.permute.xlu0 %98 }
  0x9d   :  { %v730_v33 = vcombine.low %v79_v27, %v111_v28  ;;  %v731_v34 = vcombine.high %v79_v27, %v111_v28  ;;  %v106_v35 = vrot.slane %v951_v31, 4  ;;  %v39_v39 = vrot.slane %v30_v29, 4 }
  0x9f   :  { %v112_v36 = vsel %vm44_vm0, %v105_v23, %v106_v35  ;;  %550 = vmatprep.subr.bf16.mxu0 %v731_v34 }
  0xa0   :  { %v961_v40 = vpop.permute.xlu1 %33  ;;  %551 = vmatpush1.bf16.msra.mxu0 %v730_v33  ;;  %v32_v41 = vpop.permute.xlu0 %31  ;;  %v113_v43 = vsel %vm110_vm7, %v97_v20, %v112_v36 }
  0xa1   :  { %v41_v44 = vrot.slane %v961_v40, 4  ;;  %v40_v46 = vrot.slane %v32_v41, 4  ;;  %v733_v47 = vcombine.high %v81_v37, %v113_v43  ;;  %v732_v48 = vcombine.low %v81_v37, %v113_v43 }
  0xa3   :  { %v45_v49 = vsel %vm44_vm0, %v39_v39, %v40_v46  ;;  %v48_v50 = vsel %vm44_vm0, %v40_v46, %v41_v44  ;;  %591 = vmatprep.subr.bf16.mxu1 %v733_v47 }
  0xa4   :  { %v49_v51 = vsel %vm46_vm8, %v32_v41, %v48_v50  ;;  %v263_v52 = vpop.permute.xlu1 %262  ;;  %592 = vmatpush1.bf16.msra.mxu1 %v732_v48  ;;  %v261_v53 = vpop.permute.xlu0 %260  ;;  %v47_v55 = vsel %vm46_vm8, %v30_v29, %v45_v49 }
  0xa5   :  { %v724_v56 = vcombine.low %v826_v2, %v49_v51  ;;  %v725_v57 = vcombine.high %v826_v2, %v49_v51  ;;  %v268_v58 = vrot.slane %v263_v52, 4  ;;  %v267_v59 = vrot.slane %v261_v53, 4 }
  0xa6   :  { %v723_v60 = vcombine.high %v817_v1, %v47_v55  ;;  %v722_v61 = vcombine.low %v817_v1, %v47_v55  ;;  %v985_v1 = vld [vmem:[%s1080_s1] sm:$0xf] }
  0xa7   :  { %v274_v63 = vsel %vm44_vm0, %v266_v11, %v267_v59  ;;  %v276_v4 = vsel %vm44_vm0, %v267_v59, %v268_v58  ;;  %593 = vmatprep.subr.bf16.mxu1 %v725_v57 }
  0xa8   :  { %v277_v6 = vsel %vm270_vm1, %v261_v53, %v276_v4  ;;  %552 = vmatprep.subr.bf16.mxu0 %v723_v60  ;;  %v199_v9 = vpop.permute.xlu1 %198  ;;  %594 = vmatpush1.bf16.msra.mxu1 %v724_v56  ;;  %v197_v10 = vpop.permute.xlu0 %196  ;;  %v275_v2 = vsel %vm270_vm1, %v895_v7, %v274_v63 }
  0xa9   :  { %v760_v13 = vcombine.low %v277_v6, %v277_v6  ;;  %v761_v11 = vcombine.high %v277_v6, %v277_v6  ;;  %v204_v14 = vrot.slane %v199_v9, 4  ;;  %553 = vmatpush1.bf16.msra.mxu0 %v722_v61  ;;  %v203_v15 = vrot.slane %v197_v10, 4 }
  0xaa   :  { %v759_v16 = vcombine.high %v275_v2, %v275_v2  ;;  %v758_v18 = vcombine.low %v275_v2, %v275_v2 }
  0xab   :  { %768 = vmatprep.subr.msk.bf16.mxu1 %vm44_vm0, %v761_v11  ;;  %765 = vmatmul.mubr.msk.bf16.vlgmr.msra.gmra.mxu1 %vm509_vm9, %v985_v1  ;;  %v533_v7 = vsel %vm44_vm0, %v760_v13, 0  ;;  %v210_v23 = vsel %vm44_vm0, %v202_v30, %v203_v15  ;;  %v212_v24 = vsel %vm44_vm0, %v203_v15, %v204_v14 }
  0xac   :  { %766 = vmatprep.subr.msk.bf16.mxu0 %vm44_vm0, %v759_v16  ;;  %v231_v19 = vpop.permute.xlu1 %230  ;;  %763 = vmatmul.mubr.msk.bf16.vlgmr.msra.gmra.mxu0 %vm509_vm9, %v985_v1  ;;  %v527_v20 = vsel %vm44_vm0, %v758_v18, 0  ;;  %v229_v21 = vpop.permute.xlu0 %228  ;;  %v213_v29 = vsel %vm206_vm2, %v197_v10, %v212_v24  ;;  %v211_v34 = vsel %vm206_vm2, %v903_v17, %v210_v23 }
  0xad   :  { %v236_v25 = vrot.slane %v231_v19, 4  ;;  %627 = vmatpush1.bf16.msra.mxu0 %v527_v20  ;;  %668 = vmatpush1.bf16.msra.mxu1 %v533_v7  ;;  %v235_v26 = vrot.slane %v229_v21, 4 }
  0xae   :  { %652 = vmatprep.mubr.bf16.mxu0 %v788_v3  ;;  %693 = vmatprep.mubr.bf16.mxu1 %v788_v3 }
  0xaf   :  { %v242_v27 = vsel %vm44_vm0, %v234_v42, %v235_v26  ;;  %v244_v28 = vsel %vm44_vm0, %v235_v26, %v236_v25 }
  0xb0   :  { %v245_v30 = vsel %vm238_vm3, %v229_v21, %v244_v28  ;;  %v135_v32 = vpop.permute.xlu1 %134  ;;  %v133_v33 = vpop.permute.xlu0 %132  ;;  %v243_v36 = vsel %vm238_vm3, %v915_v38, %v242_v27 }
  0xb1   :  { %v752_v37 = vcombine.low %v213_v29, %v245_v30  ;;  %v753_v3 = vcombine.high %v213_v29, %v245_v30  ;;  %v140_v39 = vrot.slane %v135_v32, 4  ;;  %v139_v41 = vrot.slane %v133_v33, 4 }
  0xb2   :  { %v750_v43 = vcombine.low %v211_v34, %v243_v36  ;;  %v751_v42 = vcombine.high %v211_v34, %v243_v36 }
  0xb3   :  { %669 = vmatprep.subr.bf16.mxu1 %v753_v3  ;;  %v146_v48 = vsel %vm44_vm0, %v138_v54, %v139_v41  ;;  %v148_v17 = vsel %vm44_vm0, %v139_v41, %v140_v39 }
  0xb4   :  { %628 = vmatprep.subr.bf16.mxu0 %v751_v42  ;;  %v167_v46 = vpop.permute.xlu1 %166  ;;  %670 = vmatpush1.bf16.msra.mxu1 %v752_v37  ;;  %v165_v47 = vpop.permute.xlu0 %164  ;;  %v149_v52 = vsel %vm142_vm4, %v133_v33, %v148_v17  ;;  %v147_v54 = vsel %vm142_vm4, %v925_v45, %v146_v48 }
  0xb5   :  { %v172_v49 = vrot.slane %v167_v46, 4  ;;  %629 = vmatpush1.bf16.msra.mxu0 %v750_v43  ;;  %v171_v38 = vrot.slane %v165_v47, 4 }
  0xb7   :  { %v178_v50 = vsel %vm44_vm0, %v170_v8, %v171_v38  ;;  %v180_v51 = vsel %vm44_vm0, %v171_v38, %v172_v49 }
  0xb8   :  { %v181_v53 = vsel %vm174_vm5, %v165_v47, %v180_v51  ;;  %v71_v55 = vpop.permute.xlu1 %70  ;;  %v69_v56 = vpop.permute.xlu0 %68  ;;  %v179_v57 = vsel %vm174_vm5, %v933_v62, %v178_v50 }
  0xb9   :  { %v744_v58 = vcombine.low %v149_v52, %v181_v53  ;;  %v745_v59 = vcombine.high %v149_v52, %v181_v53  ;;  %v76_v60 = vrot.slane %v71_v55, 4  ;;  %v75_v61 = vrot.slane %v69_v56, 4 }
  0xba   :  { %v742_v63 = vcombine.low %v147_v54, %v179_v57  ;;  %v743_v8 = vcombine.high %v147_v54, %v179_v57 }
  0xbb   :  { %671 = vmatprep.subr.bf16.mxu1 %v745_v59  ;;  %v82_v9 = vsel %vm44_vm0, %v74_v22, %v75_v61  ;;  %v84_v45 = vsel %vm44_vm0, %v75_v61, %v76_v60 }
  0xbc   :  { %630 = vmatprep.subr.bf16.mxu0 %v743_v8  ;;  %v103_v4 = vpop.permute.xlu1 %102  ;;  %672 = vmatpush1.bf16.msra.mxu1 %v744_v58  ;;  %v101_v6 = vpop.permute.xlu0 %100  ;;  %v85_v11 = vsel %vm78_vm6, %v69_v56, %v84_v45  ;;  %v83_v22 = vsel %vm78_vm6, %v943_v12, %v82_v9 }
  0xbd   :  { %v108_v10 = vrot.slane %v103_v4, 4  ;;  %631 = vmatpush1.bf16.msra.mxu0 %v742_v63  ;;  %v107_v62 = vrot.slane %v101_v6, 4 }
  0xbf   :  { %v114_v2 = vsel %vm44_vm0, %v106_v35, %v107_v62  ;;  %v116_v13 = vsel %vm44_vm0, %v107_v62, %v108_v10 }
  0xc0   :  { %v117_v14 = vsel %vm110_vm7, %v101_v6, %v116_v13  ;;  %v38_v15 = vpop.permute.xlu1 %37  ;;  %v36_v16 = vpop.permute.xlu0 %35  ;;  %v115_v18 = vsel %vm110_vm7, %v951_v31, %v114_v2 }
  0xc1   :  { %v736_v7 = vcombine.low %v85_v11, %v117_v14  ;;  %v737_v19 = vcombine.high %v85_v11, %v117_v14  ;;  %v43_v20 = vrot.slane %v38_v15, 4  ;;  %v42_v21 = vrot.slane %v36_v16, 4 }
  0xc2   :  { %v734_v23 = vcombine.low %v83_v22, %v115_v18  ;;  %v735_v35 = vcombine.high %v83_v22, %v115_v18 }
  0xc3   :  { %v50_v24 = vsel %vm44_vm0, %v41_v44, %v42_v21  ;;  %v52_v25 = vsel %vm44_vm0, %v42_v21, %v43_v20  ;;  %673 = vmatprep.subr.bf16.mxu1 %v737_v19 }
  0xc4   :  { %v53_v26 = vsel %vm46_vm8, %v36_v16, %v52_v25  ;;  %632 = vmatprep.subr.bf16.mxu0 %v735_v35  ;;  %674 = vmatpush1.bf16.msra.mxu1 %v736_v7  ;;  %v51_v12 = vsel %vm46_vm8, %v961_v40, %v50_v24 }
  0xc5   :  { %v728_v31 = vcombine.low %v872_v5, %v53_v26  ;;  %v729_v27 = vcombine.high %v872_v5, %v53_v26  ;;  %633 = vmatpush1.bf16.msra.mxu0 %v734_v23  ;;  %v726_v28 = vcombine.low %v812_v0, %v51_v12  ;;  %v727_v29 = vcombine.high %v812_v0, %v51_v12 }
  0xc7   :  { %634 = vmatprep.subr.bf16.mxu0 %v727_v29  ;;  %675 = vmatprep.subr.bf16.mxu1 %v729_v27 }
  0xc8   :  { %676 = vmatpush1.bf16.msra.mxu1 %v728_v31 }
  0xc9   :  { %635 = vmatpush1.bf16.msra.mxu0 %v726_v28 }
  0xcb   :  { %769 = vmatmul.mubr.msk.bf16.vlgmr.msra.gmra.mxu1 %vm509_vm9, %v985_v1 }
  0xcc   :  { %767 = vmatmul.mubr.msk.bf16.vlgmr.msra.gmra.mxu0 %vm509_vm9, %v985_v1 }
  0xcd   :  { %v327_v40 = vpop.permute.xlu0 %326 }
 0x16b   :  { %v613_v44 = vpop.f32.mrf.mxu1 }
 0x16c   :  { %v572_v30 = vpop.f32.mrf.mxu0  ;;  %v614_v32 = vadd.f32 %v613_v44, %v327_v40 }
 0x16d   :  { %v615_v5 = vpop.f32.mrf.mxu1  ;;  %v573_v33 = vadd.f32 %v572_v30, %v327_v40 }
 0x16e   :  { %v574_v34 = vpop.f32.mrf.mxu0  ;;  %v616_v36 = vadd.f32 %v615_v5, %v327_v40  ;;  %v704_v37 = vmax.f32 %v614_v32, 0.0 }
 0x16f   :  { %v617_v0 = vpop.f32.mrf.mxu1  ;;  %v575_v3 = vadd.f32 %v574_v34, %v327_v40  ;;  %v702_v39 = vmax.f32 %v573_v33, 0.0 }
 0x170   :  { %v576_v41 = vpop.f32.mrf.mxu0  ;;  %v705_v43 = vmax.f32 %v616_v36, 0.0  ;;  %712 = vst [vmem:[%s1081_s3 + $0x10] sm:$0xff] %v704_v37 }
 0x171   :  { %v618_v42 = vpop.f32.mrf.mxu1  ;;  %v703_v1 = vmax.f32 %v575_v3, 0.0  ;;  %710 = vst [vmem:[%s1081_s3] sm:$0xff] %v702_v39 }
 0x172   :  { %v577_v46 = vpop.f32.mrf.mxu0  ;;  %713 = vst [vmem:[%s1081_s3 + $0x18] sm:$0xff] %v705_v43 }
 0x173   :  { %711 = vst [vmem:[%s1081_s3 + $0x8] sm:$0xff] %v703_v1 }
 0x18b   :  { %v695_v47 = vpop.f32.mrf.mxu1 }
 0x18c   :  { %v654_v48 = vpop.f32.mrf.mxu0  ;;  %v696_v17 = vadd.f32 %v695_v47, %v327_v40 }
 0x18d   :  { %v655_v49 = vadd.f32 %v654_v48, %v327_v40  ;;  %v697_v38 = vpop.f32.mrf.mxu1 }
 0x18e   :  { %v708_v50 = vmax.f32 %v696_v17, 0.0  ;;  %v656_v51 = vpop.f32.mrf.mxu0  ;;  %v698_v52 = vadd.f32 %v697_v38, %v327_v40 }
 0x18f   :  { %v706_v53 = vmax.f32 %v655_v49, 0.0  ;;  %v657_v55 = vadd.f32 %v656_v51, %v327_v40  ;;  %v699_v56 = vpop.f32.mrf.mxu1 }
 0x190   :  { %716 = vst [vmem:[%s1081_s3 + $0x30] sm:$0xff] %v708_v50  ;;  %v709_v54 = vmax.f32 %v698_v52, 0.0  ;;  %v658_v57 = vpop.f32.mrf.mxu0 }
 0x191   :  { %714 = vst [vmem:[%s1081_s3 + $0x20] sm:$0xff] %v706_v53  ;;  %v707_v58 = vmax.f32 %v657_v55, 0.0  ;;  %v700_v59 = vpop.f32.mrf.mxu1 }
 0x192   :  { %717 = vst [vmem:[%s1081_s3 + $0x38] sm:$0xff] %v709_v54  ;;  %v659_v60 = vpop.f32.mrf.mxu0 }
 0x193   :  { %715 = vst [vmem:[%s1081_s3 + $0x28] sm:$0xff] %v707_v58 }

</bundles_post_ra>
